<compile_context>
chip_gen: v6e
topology: v6e:2x2x1
jax: 0.10.0
libtpu: 0.0.40
codegen_flags: <defaults>
</compile_context>

<pallas_src>
import jax
import jax.numpy as jnp
from jax import lax
from jax.experimental import pallas as pl
from jax.experimental.pallas import tpu as pltpu


def mlp_kernel(x_ref, w1_ref, b1_ref, w2_ref, b2_ref, o_ref):
    # x_ref:  [TILE_B, in_f]
    # w1_ref: [out_f, in_f]   (PyTorch layout, contracted on its last dim)
    # b1_ref: [1, out_f]
    # w2_ref: [in_f, out_f]   (PyTorch layout, contracted on its last dim)
    # b2_ref: [1, in_f]
    # o_ref:  [TILE_B, in_f]
    x = x_ref[...]

    # linear_1: x @ W1^T  (contract in_f with in_f) -> [TILE_B, out_f], f32 acc.
    h = lax.dot_general(
        x, w1_ref[...],
        dimension_numbers=(((1,), (1,)), ((), ())),
        preferred_element_type=jnp.float32,
    )
    h = h + b1_ref[...].astype(jnp.float32)

    # linear_2: h @ W2^T  (contract out_f with out_f) -> [TILE_B, in_f], f32 acc.
    y = lax.dot_general(
        h.astype(x.dtype), w2_ref[...],
        dimension_numbers=(((1,), (1,)), ((), ())),
        preferred_element_type=jnp.float32,
    )
    y = y + b2_ref[...].astype(jnp.float32)

    o_ref[...] = y.astype(o_ref.dtype)


def test_model_forward(x, w1, b1, w2, b2, *, tile_b=512):
    """x: [B, in_f]; w1: [out_f, in_f]; b1: [out_f]; w2: [in_f, out_f]; b2: [in_f]."""
    B, in_f = x.shape
    out_f = w1.shape[0]

    # Batch tile: big enough to hide DMA behind compute, small enough for VMEM
    # (weights + bias + 2x double-buffered x/out tiles must fit the scoped limit).
    tile_b = min(tile_b, B)
    grid_b = pl.cdiv(B, tile_b)

    # Biases as (1, N) VMEM blocks (broadcast along sublanes in the kernel).
    b1_2d = b1.reshape(1, out_f)
    b2_2d = b2.reshape(1, in_f)

    itemsize = jnp.dtype(x.dtype).itemsize
    cost = pl.CostEstimate(
        flops=4 * B * in_f * out_f + B * (in_f + out_f),
        transcendentals=0,
        bytes_accessed=(x.size + w1.size + b1.size + w2.size + b2.size + B * in_f)
        * itemsize,
    )

    return pl.pallas_call(
        mlp_kernel,
        out_shape=jax.ShapeDtypeStruct((B, in_f), x.dtype),
        grid_spec=pltpu.PrefetchScalarGridSpec(
            num_scalar_prefetch=0,
            grid=(grid_b,),
            in_specs=[
                pl.BlockSpec((tile_b, in_f), lambda i: (i, 0)),   # x: tiled on batch
                pl.BlockSpec((out_f, in_f), lambda i: (0, 0)),    # w1: VMEM-resident
                pl.BlockSpec((1, out_f), lambda i: (0, 0)),       # b1: VMEM-resident
                pl.BlockSpec((in_f, out_f), lambda i: (0, 0)),    # w2: VMEM-resident
                pl.BlockSpec((1, in_f), lambda i: (0, 0)),        # b2: VMEM-resident
            ],
            out_specs=pl.BlockSpec((tile_b, in_f), lambda i: (i, 0)),
        ),
        compiler_params=pltpu.CompilerParams(
            dimension_semantics=("parallel",),   # shard batch tiles across TCs (v7x)
        ),
        cost_estimate=cost,
    )(x, w1, b1_2d, w2, b2_2d)


if __name__ == "__main__":
    # Small shapes consistent with the module: in_features=32, out_features=64, batch=8.
    B, in_features, out_features = 8, 32, 64

    key = jax.random.PRNGKey(0)
    kx, kw1, kb1, kw2, kb2 = jax.random.split(key, 5)

    # Deterministic PyTorch-Linear-style init: U(-1/sqrt(fan_in), 1/sqrt(fan_in)).
    bound1 = 1.0 / (in_features ** 0.5)
    bound2 = 1.0 / (out_features ** 0.5)
    x = jax.random.normal(kx, (B, in_features), dtype=jnp.float32)
    w1 = jax.random.uniform(kw1, (out_features, in_features), jnp.float32, -bound1, bound1)
    b1 = jax.random.uniform(kb1, (out_features,), jnp.float32, -bound1, bound1)
    w2 = jax.random.uniform(kw2, (in_features, out_features), jnp.float32, -bound2, bound2)
    b2 = jax.random.uniform(kb2, (in_features,), jnp.float32, -bound2, bound2)

    out = test_model_forward(x, w1, b1, w2, b2)
    out = jax.block_until_ready(out)

    # Reference check in plain JAX.
    ref = (x @ w1.T + b1) @ w2.T + b2
    assert out.shape == (B, in_features)
    assert jnp.allclose(out, ref, atol=1e-5, rtol=1e-5)

    print("KERNEL_OK")
</pallas_src>

<mosaic_0001>
module attributes {stable_mosaic.version = 11 : i64} {
  func.func @mlp_kernel(%arg0: i32, %arg1: memref<8x32xf32, #tpu.memory_space<vmem>>, %arg2: memref<64x32xf32, #tpu.memory_space<vmem>>, %arg3: memref<1x64xf32, #tpu.memory_space<vmem>>, %arg4: memref<32x64xf32, #tpu.memory_space<vmem>>, %arg5: memref<1x32xf32, #tpu.memory_space<vmem>>, %arg6: memref<8x32xf32, #tpu.memory_space<vmem>>) attributes {dimension_semantics = [#tpu.dimension_semantics<parallel>], iteration_bounds = array<i64: 1>, scalar_prefetch = 0 : i64, scratch_operands = 0 : i64, tpu.core_type = #tpu.core_type<tc>, window_params = [{transform_indices = @transform_0, window_bounds = array<i64: 8, 32>}, {pipeline_mode = #tpu.pipeline_mode<synchronous>, transform_indices = @transform_1, window_bounds = array<i64: 64, 32>}, {pipeline_mode = #tpu.pipeline_mode<synchronous>, transform_indices = @transform_2, window_bounds = array<i64: 1, 64>}, {pipeline_mode = #tpu.pipeline_mode<synchronous>, transform_indices = @transform_3, window_bounds = array<i64: 32, 64>}, {pipeline_mode = #tpu.pipeline_mode<synchronous>, transform_indices = @transform_4, window_bounds = array<i64: 1, 32>}, {transform_indices = @transform_5, window_bounds = array<i64: 8, 32>}]} {
    %c0 = arith.constant 0 : index
    %c0_0 = arith.constant 0 : index
    %0 = vector.load %arg1[%c0, %c0_0] : memref<8x32xf32, #tpu.memory_space<vmem>>, vector<8x32xf32>
    %c0_1 = arith.constant 0 : index
    %c0_2 = arith.constant 0 : index
    %1 = vector.load %arg2[%c0_1, %c0_2] : memref<64x32xf32, #tpu.memory_space<vmem>>, vector<64x32xf32>
    %cst = arith.constant dense<0.000000e+00> : vector<8x64xf32>
    %2 = tpu.matmul %0, %1, %cst {dimension_numbers = #tpu.dot_dimension_numbers<[1], [1], [0], [0], [0, 0, 1, 0], [], []>} : vector<8x32xf32>, vector<64x32xf32>, vector<8x64xf32> -> vector<8x64xf32>
    %c0_3 = arith.constant 0 : index
    %c0_4 = arith.constant 0 : index
    %3 = vector.load %arg3[%c0_3, %c0_4] : memref<1x64xf32, #tpu.memory_space<vmem>>, vector<1x64xf32>
    %4 = vector.broadcast %3 : vector<1x64xf32> to vector<8x64xf32>
    %5 = arith.addf %2, %4 : vector<8x64xf32>
    %c0_5 = arith.constant 0 : index
    %c0_6 = arith.constant 0 : index
    %6 = vector.load %arg4[%c0_5, %c0_6] : memref<32x64xf32, #tpu.memory_space<vmem>>, vector<32x64xf32>
    %cst_7 = arith.constant dense<0.000000e+00> : vector<8x32xf32>
    %7 = tpu.matmul %5, %6, %cst_7 {dimension_numbers = #tpu.dot_dimension_numbers<[1], [1], [0], [0], [0, 0, 1, 0], [], []>} : vector<8x64xf32>, vector<32x64xf32>, vector<8x32xf32> -> vector<8x32xf32>
    %c0_8 = arith.constant 0 : index
    %c0_9 = arith.constant 0 : index
    %8 = vector.load %arg5[%c0_8, %c0_9] : memref<1x32xf32, #tpu.memory_space<vmem>>, vector<1x32xf32>
    %9 = vector.broadcast %8 : vector<1x32xf32> to vector<8x32xf32>
    %10 = arith.addf %7, %9 : vector<8x32xf32>
    %c0_10 = arith.constant 0 : index
    %c0_11 = arith.constant 0 : index
    %11 = vector.load %arg6[%c0_10, %c0_11] : memref<8x32xf32, #tpu.memory_space<vmem>>, vector<8x32xf32>
    tpu.vector_store %arg6[%c0_10, %c0_11], %10 {strides = array<i32>} : memref<8x32xf32, #tpu.memory_space<vmem>>, vector<8x32xf32>,
    return
  }
  func.func @transform_0(%arg0: i32) -> (i32, i32) {
    %c0_i32 = arith.constant 0 : i32
    %c0_i32_0 = arith.constant 0 : i32
    return %arg0, %c0_i32 : i32, i32
  }
  func.func @transform_1(%arg0: i32) -> (i32, i32) {
    %c0_i32 = arith.constant 0 : i32
    %c0_i32_0 = arith.constant 0 : i32
    %c0_i32_1 = arith.constant 0 : i32
    return %c0_i32, %c0_i32_0 : i32, i32
  }
  func.func @transform_2(%arg0: i32) -> (i32, i32) {
    %c0_i32 = arith.constant 0 : i32
    %c0_i32_0 = arith.constant 0 : i32
    %c0_i32_1 = arith.constant 0 : i32
    return %c0_i32, %c0_i32_0 : i32, i32
  }
  func.func @transform_3(%arg0: i32) -> (i32, i32) {
    %c0_i32 = arith.constant 0 : i32
    %c0_i32_0 = arith.constant 0 : i32
    %c0_i32_1 = arith.constant 0 : i32
    return %c0_i32, %c0_i32_0 : i32, i32
  }
  func.func @transform_4(%arg0: i32) -> (i32, i32) {
    %c0_i32 = arith.constant 0 : i32
    %c0_i32_0 = arith.constant 0 : i32
    %c0_i32_1 = arith.constant 0 : i32
    return %c0_i32, %c0_i32_0 : i32, i32
  }
  func.func @transform_5(%arg0: i32) -> (i32, i32) {
    %c0_i32 = arith.constant 0 : i32
    %c0_i32_0 = arith.constant 0 : i32
    return %arg0, %c0_i32 : i32, i32
  }
}

</mosaic_0001>

<bundles_post_ra>
// kernel: tpu_custom_call.1
= control target key start
LH: loop header
LB: loop body
LE: loop exit
PB: predicated region body
PF: predicated region fallthrough
CT: control target
= control target key end

     0   :  { %vm37_vm0 = vcmask 261120   ;;  %v332_v1 = vmov 0.0   ;;  %vm333_vm1 = vmmov 0   ;;  %vm146_vm2 = vcmask 523264   ;;  %s428_s0 = inlined_call_operand.vmem [shape: f32[8,32], index: 0, kind: input, shape index: {}]   ;;  %s429_s1 = inlined_call_operand.vmem [shape: f32[64,32], index: 1, kind: input, shape index: {}]   ;;  %s430_s2 = inlined_call_operand.vmem [shape: f32[1,64], index: 2, kind: input, shape index: {}]   ;;  %s431_s3 = inlined_call_operand.vmem [shape: f32[32,64], index: 3, kind: input, shape index: {}]   ;;  %s432_s4 = inlined_call_operand.vmem [shape: f32[1,32], index: 4, kind: input, shape index: {}]   ;;  %s433_s5 = inlined_call_operand.hbm [shape: f32[8,32], index: 5, kind: output, shape index: {}]  }
   0x1   :  { %v29_v0 = vld [vmem:[%s429_s1 + $0x38] sm:$0xff]  ;;  %277 = vmatprep.subr.mxu0 %v332_v1  ;;  %293 = vmatprep.mubr.msk.f32.mxu0 %vm333_vm1, %v332_v1  ;;  %v28_v2 = vld [vmem:[%s429_s1 + $0x30] sm:$0xff] }
   0x2   :  { %278 = vmatpush3.xpose.msk.msra.mxu0 %vm37_vm0, %v29_v0  ;;  %296 = vmatprep.subr.mxu1 %v332_v1  ;;  %v138_v3 = vld [vmem:[%s431_s3 + $0x18] sm:$0xff] }
   0x3   :  { %279 = vmatprep.subr.mxu0 %v332_v1  ;;  %304 = vmatprep.mubr.msk.f32.mxu1 %vm333_vm1, %v332_v1 }
   0x4   :  { %297 = vmatpush3.xpose.msk.msra.mxu1 %vm146_vm2, %v138_v3 }
   0x5   :  { %10 = vsyncpa [#allocation3], 0  ;;  %298 = vmatprep.subr.mxu1 %v332_v1  ;;  %v137_v4 = vld [vmem:[%s431_s3 + $0x10] sm:$0xff]  ;;  %v27_v5 = vld [vmem:[%s429_s1 + $0x28] sm:$0xff] }
   0x6   :  { %280 = vmatpush3.xpose.msk.msra.mxu0 %vm37_vm0, %v28_v2  ;;  %v136_v6 = vld [vmem:[%s431_s3 + $0x8] sm:$0xff]  ;;  %v26_v7 = vld [vmem:[%s429_s1 + $0x20] sm:$0xff]  ;;  %v25_v8 = vld [vmem:[%s429_s1 + $0x18] sm:$0xff] }
   0x7   :  { %281 = vmatprep.subr.mxu0 %v332_v1  ;;  %v24_v9 = vld [vmem:[%s429_s1 + $0x10] sm:$0xff]  ;;  %v23_v10 = vld [vmem:[%s429_s1 + $0x8] sm:$0xff]  ;;  %v22_v11 = vld [vmem:[%s429_s1] sm:$0xff] }
   0x8   :  { %299 = vmatpush3.xpose.msk.msra.mxu1 %vm146_vm2, %v137_v4  ;;  %v21_v12 = vld [vmem:[%s428_s0] sm:$0xff]  ;;  %s334_s0 = smov [#allocation2]  }
   0x9   :  { %300 = vmatprep.subr.mxu1 %v332_v1  ;;  %v135_v13 = vld [vmem:[%s431_s3] sm:$0xff]  ;;  %s239_s22 = sshll.u32 %s334_s0, 4  ;;  %s240_s22 = int_to_ptr.vmem [resolvable:$true] %s239_s22 }
   0xa   :  { %282 = vmatpush3.xpose.msk.msra.mxu0 %vm37_vm0, %v27_v5  ;;  %v247_v14 = vld [vmem:[%s430_s2] ss:$0 sm:$0xff]  ;;  %s310_s3 = scalar_lea.vmem %s240_s22, 128  ;;  %p315_p1 = scmp.lt.s32.totalorder %s240_s22, %s240_s22 }
   0xb   :  { %283 = vmatprep.subr.mxu0 %v332_v1  ;;  %v257_v18 = vld [vmem:[%s432_s4] ss:$0 sm:$0xff]  ;;  %p311_p0 = scmp.ne.s32.totalorder %s240_s22, %s310_s3  ;;  %p316_p2 = scmp.lt.s32.totalorder %s310_s3, %s310_s3 }
   0xc   :  { %301 = vmatpush3.xpose.msk.msra.mxu1 %vm146_vm2, %v136_v6 }
   0xd   :  { %302 = vmatprep.subr.mxu1 %v332_v1  ;;  %p317_p3 = por %p316_p2, %p315_p1 }
   0xe   :  { %284 = vmatpush3.xpose.msk.msra.mxu0 %vm37_vm0, %v26_v7 }
   0xf   :  { %285 = vmatprep.subr.mxu0 %v332_v1  ;;  %p318_p4 = pnand %p317_p3, %p311_p0 }
  0x10   :  { %303 = vmatpush3.xpose.msk.msra.mxu1 %vm146_vm2, %v135_v13 }
  0x12   :  { %286 = vmatpush3.xpose.msk.msra.mxu0 %vm37_vm0, %v25_v8 }
  0x13   :  { %287 = vmatprep.subr.mxu0 %v332_v1 }
  0x16   :  { %288 = vmatpush3.xpose.msk.msra.mxu0 %vm37_vm0, %v24_v9 }
  0x17   :  { %289 = vmatprep.subr.mxu0 %v332_v1 }
  0x1a   :  { %290 = vmatpush3.xpose.msk.msra.mxu0 %vm37_vm0, %v23_v10 }
  0x1b   :  { %291 = vmatprep.subr.mxu0 %v332_v1 }
  0x1e   :  { %292 = vmatpush3.xpose.msk.msra.mxu0 %vm37_vm0, %v22_v11 }
  0x21   :  { %294 = vmatmul.mubr.msk.f32.vlgmr.msra.gmra.mxu0 %vm37_vm0, %v21_v12 }
  0xe1   :  { %v131_v15 = vpop.f32.mrf.mxu0 }
  0xe2   :  { %v132_v16 = vadd.f32 %v247_v14, %v131_v15 }
  0xe3   :  { %v295_v17 = vpop.f32.mrf.mxu0 }
  0xe4   :  { %305 = vmatmul.mubr.msk.f32.vlgmr.msra.gmra.mxu1 %vm146_vm2, %v132_v16 }
 0x1a4   :  { %v228_v19 = vpop.f32.mrf.mxu1 }
 0x1a5   :  { %v229_v20 = vadd.f32 %v257_v18, %v228_v19 }
 0x1a6   :  { %v306_v21 = vpop.f32.mrf.mxu1 }
 0x1a7   :  { %232 = vst.msk [vmem:[#allocation2] sm:$0xff] %vm37_vm0, %v229_v20 }
 0x1a8   :  { %321 = shalt.err (!%p318_p4)
}
 0x1a9   :  { %242 = dma.vmem_to_hbm [thread:$0]  %s240_s22, 128, %s433_s5, [#allocation3]  }
 0x1aa   :  { %330 = dma.done.wait [#allocation3], 128  }
 0x1ab   :  { %331 = vsyncadd [#allocation3], 4294967168 }
 0x1ac   :  { %246 = vsyncpa [#allocation3], 1 }

</bundles_post_ra>
